<compile_context>
chip_gen: v7x
topology: tpu7x:2x2x1
jax: 0.10.0
libtpu: 0.0.40
codegen_flags: <defaults>
</compile_context>

<pallas_src>
from functools import partial
from itertools import permutations

import jax
import jax.numpy as jnp
from jax.experimental import pallas as pl
from jax.experimental.pallas import tpu as pltpu


def _pairwise_sisdr_kernel(est_ref, gt_ref, out_ref, *, eps, zero_mean):
    """Pairwise SI-SDR for a block of batch rows.

    est_ref, gt_ref : (B_BLK, S, T) VMEM tiles
    out_ref         : (B_BLK, S, S) VMEM tile; out[b, i, j] = SI-SDR(est_b_i, gt_b_j)
    """
    est = est_ref[...].astype(jnp.float32)  # (Bb, S, T)
    gt = gt_ref[...].astype(jnp.float32)    # (Bb, S, T)

    if zero_mean:
        est = est - jnp.mean(est, axis=-1, keepdims=True)
        gt = gt - jnp.mean(gt, axis=-1, keepdims=True)

    # dot[b, i, j] = sum_t est[b, i, t] * gt[b, j, t]
    # Batched contraction over T directly (no transpose / (T, S) buffer) -> MXU.
    dot = jnp.einsum("bst,bqt->bsq", est, gt,
                     preferred_element_type=jnp.float32)      # (Bb, S, S)
    ss_gt = jnp.sum(gt * gt, axis=-1)                          # (Bb, S)
    ss_est = jnp.sum(est * est, axis=-1)                       # (Bb, S)

    alpha = dot / (ss_gt[:, None, :] + eps)                    # (Bb, S, S)
    target_e = alpha * alpha * ss_gt[:, None, :]               # ||alpha * gt_j||^2
    # ||est_i - alpha * gt_j||^2 expanded (avoids an (S, S, T) intermediate).
    noise_e = ss_est[:, :, None] - 2.0 * alpha * dot + target_e
    # Guard against f32 catastrophic cancellation near-perfect reconstruction:
    # the true residual energy is >= 0 by construction.
    noise_e = jnp.maximum(noise_e, 0.0)

    si_sdr = 10.0 * jnp.log10(target_e / (noise_e + eps) + eps)
    out_ref[...] = si_sdr


def _choose_b_blk(B, S, T, itemsize, vmem_budget_bytes=24 * 1024 * 1024):
    """Pick batch-rows-per-block so double-buffered inputs + f32 working copies
    fit a conservative VMEM budget, while keeping >= 2 grid steps (megacore)."""
    s_pad = -(-S // 8) * 8
    t_pad = -(-T // 128) * 128
    # 2 inputs x 2 pipeline buffers at input dtype + ~2 f32 working copies.
    per_row = s_pad * t_pad * (4 * itemsize + 2 * 4)
    b_blk = max(1, vmem_budget_bytes // per_row)
    if B >= 2:
        b_blk = min(b_blk, -(-B // 2))  # leave at least 2 grid steps for 2 TCs
    return int(min(b_blk, B))


def pairwise_si_sdr(est, gt, *, eps=1e-8, zero_mean=True, b_blk=None):
    """Returns the (B, S, S) pairwise SI-SDR matrix computed in Pallas."""
    B, S, T = est.shape
    itemsize = jnp.dtype(est.dtype).itemsize
    if b_blk is None:
        b_blk = _choose_b_blk(B, S, T, itemsize)

    # Pad batch to a multiple of b_blk (padded rows are dropped afterwards).
    n_blocks = pl.cdiv(B, b_blk)
    B_pad = n_blocks * b_blk
    if B_pad != B:
        pad = B_pad - B
        est = jnp.pad(est, ((0, pad), (0, 0), (0, 0)))
        gt = jnp.pad(gt, ((0, pad), (0, 0), (0, 0)))

    kernel = partial(_pairwise_sisdr_kernel, eps=eps, zero_mean=zero_mean)
    out = pl.pallas_call(
        kernel,
        out_shape=jax.ShapeDtypeStruct((B_pad, S, S), jnp.float32),
        grid=(n_blocks,),
        in_specs=[
            pl.BlockSpec((b_blk, S, T), lambda b: (b, 0, 0)),
            pl.BlockSpec((b_blk, S, T), lambda b: (b, 0, 0)),
        ],
        out_specs=pl.BlockSpec((b_blk, S, S), lambda b: (b, 0, 0)),
        compiler_params=pltpu.CompilerParams(
            dimension_semantics=("parallel",),
            vmem_limit_bytes=64 * 1024 * 1024,
        ),
        cost_estimate=pl.CostEstimate(
            flops=2 * B_pad * S * S * T + 6 * B_pad * S * T,
            transcendentals=B_pad * S * S,
            bytes_accessed=2 * B_pad * S * T * itemsize + B_pad * S * S * 4,
        ),
    )(est, gt)
    return out[:B]
    # NOTE: for very long T (multi-second audio) a T-tiled variant with
    # accumulated Gram / sum / sum-of-squares scratch would bound VMEM per tile.


def si_sdr_loss(est, gt, *, eps=1e-8, zero_mean=True):
    """Scale-invariant SDR loss with PIT (matches SI_SDRLoss.forward)."""
    B, S, _ = est.shape
    pw = pairwise_si_sdr(est, gt, eps=eps, zero_mean=zero_mean)  # (B, S, S)

    # Vectorized PIT: scores[b, p, s] = pw[b, s, perms[p, s]].
    perms = jnp.asarray(list(permutations(range(S))), dtype=jnp.int32)  # (P, S)
    src = jnp.arange(S, dtype=jnp.int32)[None, :]                       # (1, S)
    scores = pw[:, src, perms]                                          # (B, P, S)
    perm_sums = jnp.sum(scores, axis=-1)                                # (B, P)
    # Reference initializes the running max with zeros, i.e. max(0, max_p sum).
    loss = jnp.maximum(0.0, jnp.max(perm_sums, axis=-1))                # (B,)
    return -jnp.mean(loss)


if __name__ == "__main__":
    B, S, T = 2, 3, 256  # small shapes consistent with (batch, num_sources, time)
    key = jax.random.PRNGKey(0)
    k_gt, k_noise = jax.random.split(key)
    gt = jax.random.normal(k_gt, (B, S, T), dtype=jnp.float32)
    est = gt + 0.1 * jax.random.normal(k_noise, (B, S, T), dtype=jnp.float32)

    loss = si_sdr_loss(est, gt)
    jax.block_until_ready(loss)

    print("KERNEL_OK")
</pallas_src>

<mosaic_0001>
module attributes {stable_mosaic.version = 11 : i64} {
  func.func @_pairwise_sisdr_kernel(%arg0: i32, %arg1: memref<1x3x256xf32, #tpu.memory_space<vmem>>, %arg2: memref<1x3x256xf32, #tpu.memory_space<vmem>>, %arg3: memref<1x3x3xf32, #tpu.memory_space<vmem>>) attributes {dimension_semantics = [#tpu.dimension_semantics<parallel>], iteration_bounds = array<i64: 2>, scalar_prefetch = 0 : i64, scratch_operands = 0 : i64, tpu.core_type = #tpu.core_type<tc>, window_params = [{transform_indices = @transform_0, window_bounds = array<i64: 1, 3, 256>}, {transform_indices = @transform_1, window_bounds = array<i64: 1, 3, 256>}, {transform_indices = @transform_2, window_bounds = array<i64: 1, 3, 3>}]} {
    %c0 = arith.constant 0 : index
    %c0_0 = arith.constant 0 : index
    %c0_1 = arith.constant 0 : index
    %0 = vector.load %arg1[%c0, %c0_0, %c0_1] : memref<1x3x256xf32, #tpu.memory_space<vmem>>, vector<1x3x256xf32>
    %c0_2 = arith.constant 0 : index
    %c0_3 = arith.constant 0 : index
    %c0_4 = arith.constant 0 : index
    %1 = vector.load %arg2[%c0_2, %c0_3, %c0_4] : memref<1x3x256xf32, #tpu.memory_space<vmem>>, vector<1x3x256xf32>
    %cst = arith.constant dense<0.000000e+00> : vector<1x3xf32>
    %2 = vector.multi_reduction <add>, %0, %cst [2] : vector<1x3x256xf32> to vector<1x3xf32>
    %3 = vector.shape_cast %2 : vector<1x3xf32> to vector<1x3x1xf32>
    %cst_5 = arith.constant 2.560000e+02 : f32
    %4 = vector.broadcast %cst_5 : f32 to vector<1x3x1xf32>
    %5 = arith.divf %3, %4 : vector<1x3x1xf32>
    %6 = vector.broadcast %5 : vector<1x3x1xf32> to vector<1x3x256xf32>
    %7 = arith.subf %0, %6 : vector<1x3x256xf32>
    %cst_6 = arith.constant dense<0.000000e+00> : vector<1x3xf32>
    %8 = vector.multi_reduction <add>, %1, %cst_6 [2] : vector<1x3x256xf32> to vector<1x3xf32>
    %9 = vector.shape_cast %8 : vector<1x3xf32> to vector<1x3x1xf32>
    %cst_7 = arith.constant 2.560000e+02 : f32
    %10 = vector.broadcast %cst_7 : f32 to vector<1x3x1xf32>
    %11 = arith.divf %9, %10 : vector<1x3x1xf32>
    %12 = vector.broadcast %11 : vector<1x3x1xf32> to vector<1x3x256xf32>
    %13 = arith.subf %1, %12 : vector<1x3x256xf32>
    "tpu.trace_start"() <{level = 10 : i32, message = "bst,bqt->bsq"}> : () -> ()
    %cst_8 = arith.constant dense<0.000000e+00> : vector<1x3x3xf32>
    %14 = tpu.matmul %7, %13, %cst_8 {dimension_numbers = #tpu.dot_dimension_numbers<[2], [2], [1], [1], [0, 0, 0, 1, 1, 1], [0], [0]>} : vector<1x3x256xf32>, vector<1x3x256xf32>, vector<1x3x3xf32> -> vector<1x3x3xf32>
    "tpu.trace_stop"() : () -> ()
    %15 = arith.mulf %13, %13 : vector<1x3x256xf32>
    %cst_9 = arith.constant dense<0.000000e+00> : vector<1x3xf32>
    %16 = vector.multi_reduction <add>, %15, %cst_9 [2] : vector<1x3x256xf32> to vector<1x3xf32>
    %17 = arith.mulf %7, %7 : vector<1x3x256xf32>
    %cst_10 = arith.constant dense<0.000000e+00> : vector<1x3xf32>
    %18 = vector.multi_reduction <add>, %17, %cst_10 [2] : vector<1x3x256xf32> to vector<1x3xf32>
    %19 = vector.shape_cast %16 : vector<1x3xf32> to vector<1x1x3xf32>
    %cst_11 = arith.constant 9.99999993E-9 : f32
    %20 = vector.broadcast %cst_11 : f32 to vector<1x1x3xf32>
    %21 = arith.addf %19, %20 : vector<1x1x3xf32>
    %22 = vector.broadcast %21 : vector<1x1x3xf32> to vector<1x3x3xf32>
    %23 = arith.divf %14, %22 : vector<1x3x3xf32>
    %24 = arith.mulf %23, %23 : vector<1x3x3xf32>
    %25 = vector.shape_cast %16 : vector<1x3xf32> to vector<1x1x3xf32>
    %26 = vector.broadcast %25 : vector<1x1x3xf32> to vector<1x3x3xf32>
    %27 = arith.mulf %24, %26 : vector<1x3x3xf32>
    %28 = vector.shape_cast %18 : vector<1x3xf32> to vector<1x3x1xf32>
    %cst_12 = arith.constant 2.000000e+00 : f32
    %29 = vector.broadcast %cst_12 : f32 to vector<1x3x3xf32>
    %30 = arith.mulf %29, %23 : vector<1x3x3xf32>
    %31 = arith.mulf %30, %14 : vector<1x3x3xf32>
    %32 = vector.broadcast %28 : vector<1x3x1xf32> to vector<1x3x3xf32>
    %33 = arith.subf %32, %31 : vector<1x3x3xf32>
    %34 = arith.addf %33, %27 : vector<1x3x3xf32>
    %cst_13 = arith.constant 0.000000e+00 : f32
    %35 = vector.broadcast %cst_13 : f32 to vector<1x3x3xf32>
    %36 = arith.maximumf %34, %35 : vector<1x3x3xf32>
    %cst_14 = arith.constant 9.99999993E-9 : f32
    %37 = vector.broadcast %cst_14 : f32 to vector<1x3x3xf32>
    %38 = arith.addf %36, %37 : vector<1x3x3xf32>
    %39 = arith.divf %27, %38 : vector<1x3x3xf32>
    %cst_15 = arith.constant 9.99999993E-9 : f32
    %40 = vector.broadcast %cst_15 : f32 to vector<1x3x3xf32>
    %41 = arith.addf %39, %40 : vector<1x3x3xf32>
    %42 = math.log %41 : vector<1x3x3xf32>
    %cst_16 = arith.constant 0.434294492 : f32
    %43 = vector.broadcast %cst_16 : f32 to vector<1x3x3xf32>
    %44 = arith.mulf %42, %43 : vector<1x3x3xf32>
    %cst_17 = arith.constant 1.000000e+01 : f32
    %45 = vector.broadcast %cst_17 : f32 to vector<1x3x3xf32>
    %46 = arith.mulf %45, %44 : vector<1x3x3xf32>
    %c0_18 = arith.constant 0 : index
    %c0_19 = arith.constant 0 : index
    %c0_20 = arith.constant 0 : index
    %47 = vector.load %arg3[%c0_18, %c0_19, %c0_20] : memref<1x3x3xf32, #tpu.memory_space<vmem>>, vector<1x3x3xf32>
    tpu.vector_store %arg3[%c0_18, %c0_19, %c0_20], %46 {strides = array<i32>} : memref<1x3x3xf32, #tpu.memory_space<vmem>>, vector<1x3x3xf32>,
    return
  }
  func.func @transform_0(%arg0: i32) -> (i32, i32, i32) {
    %c0_i32 = arith.constant 0 : i32
    %c0_i32_0 = arith.constant 0 : i32
    %c0_i32_1 = arith.constant 0 : i32
    return %arg0, %c0_i32, %c0_i32_0 : i32, i32, i32
  }
  func.func @transform_1(%arg0: i32) -> (i32, i32, i32) {
    %c0_i32 = arith.constant 0 : i32
    %c0_i32_0 = arith.constant 0 : i32
    %c0_i32_1 = arith.constant 0 : i32
    return %arg0, %c0_i32, %c0_i32_0 : i32, i32, i32
  }
  func.func @transform_2(%arg0: i32) -> (i32, i32, i32) {
    %c0_i32 = arith.constant 0 : i32
    %c0_i32_0 = arith.constant 0 : i32
    %c0_i32_1 = arith.constant 0 : i32
    return %arg0, %c0_i32, %c0_i32_0 : i32, i32, i32
  }
}

</mosaic_0001>

<bundles_post_ra>
// kernel: tpu_custom_call.1
= control target key start
LH: loop header
LB: loop body
LE: loop exit
PB: predicated region body
PF: predicated region fallthrough
CT: control target
= control target key end

     0   :  { %7 = vsyncpa [#allocation3], 0  ;;  %s926_s0 = inlined_call_operand.hbm [shape: f32[2,3,256], index: 0, kind: input, shape index: {}]   ;;  %s927_s1 = inlined_call_operand.hbm [shape: f32[2,3,256], index: 1, kind: input, shape index: {}]   ;;  %s928_s2 = inlined_call_operand.hbm [shape: f32[2,3,3], index: 2, kind: output, shape index: {}]  }
   0x1   :  { %9 = vsyncpa [#allocation3 + $0x1], 0 }
   0x2   :  { %10 = vsyncpa [#allocation6], 0 }
   0x3   :  { %12 = vsyncpa [#allocation6 + $0x1], 0 }
   0x4   :  { %13 = vsyncpa [#allocation4], 0 }
   0x5   :  { %15 = vsyncpa [#allocation4 + $0x1], 0  ;;  %s708_s9 = smov 0   ;;  %s710_s10 = smov 0  }
   0x6   :  { %s712_s11 = smov 0   ;;  %s714_s12 = smov 0  }
   0x7 LB: > { %s729_s13 = sadd.s32 4294967295, %s687_s12   ;;  %s478_s14 = sadd.s32 4294967294, %s687_s12   ;;  %s687_s12 = sphi %s714_s12, %s947_s12   ;;  %s683_s11 = sphi %s712_s11, %s946_s11   ;;  %s679_s10 = sphi %s710_s10, %s945_s10   ;;  %s675_s9 = sphi %s708_s9, %s944_s9  }
   0x8   : > { %s733_s15 = sadd.s32 1, %s687_s12   ;;  %s28_s16 = sadd.s32 1, %s683_s11 }
   0x9   : > { %s25_s17 = ssub.s32 %s687_s12, %s733_s15  ;;  %p35_p0 = scmp.ne.s32.totalorder %s683_s11, %s679_s10 }
   0xa   : > { %p26_p1 = scmp.eq.s32.totalorder %s25_s17, 0  ;;  %p36_p2 = scmp.eq.s32.totalorder %s687_s12, 0 }
   0xb   : > { %p41_p3 = scmp.ne.s32.totalorder %s679_s10, %s675_s9  ;;  %p42_p4 = scmp.eq.s32.totalorder %s729_s13, 0 }
   0xc   : > { %s745_s18 = scalar_select %p26_p1, %s683_s11, %s28_s16  }
   0xd   : > { %p747_p5 = por %p36_p2, %p35_p0  ;;  %p751_p6 = por %p42_p4, %p41_p3 }
   0xe   : > { %p91_p7 = scmp.eq.s32.totalorder %s729_s13, 1  ;;  %p97_p8 = scmp.eq.s32.totalorder %s478_s14, 1 }
   0xf   : > { %s932_s20 = scalar_select %p751_p6, 1, 0 }
  0x10   : > { %p514_p10 = scmp.lt.s32.totalorder %s687_s12, 2  ;;  %p758_p11 = por %p91_p7, %p35_p0 }
  0x11   : > { %p762_p12 = por %p97_p8, %p41_p3  ;;  %s767_s23 = sand.u32 1, %s683_s11  }
  0x12   : > { %s933_s21 = scalar_select %p758_p11, 1, 0 }
  0x13   : > { %s934_s22 = scalar_select %p762_p12, 1, 0 }
  0x14   : > { %s495_s24 = sshll.u32 %s687_s12, 7  ;;  %s481_s25 = sshll.u32 %s767_s23, 3 }
  0x15   : > { %s776_s28 = scalar_lea.hbm %s926_s0, %s495_s24  ;;  %s121_s29 = scalar_lea.vmem [#allocation2], %s481_s25 }
  0x16   : > { %s129_s30 = sshll.u32 %s121_s29, 4  ;;  %p782_p13 = pnand %p514_p10, %p747_p5  ;;  %s786_s30 = int_to_ptr.vmem [resolvable:$true] %s129_s30 }
  0x17   : > { %s118_s4 = scalar_lea.sflag [#allocation3], %s767_s23  ;;  %s557_s5 = scalar_lea.hbm %s776_s28, 128 }
  0x18   : > { %p558_p2 = scmp.ne.s32.totalorder %s776_s28, %s557_s5  ;;  %p559_p3 = pneg %p782_p13 }
  0x19   : > { %s562_s8 = scalar_lea.hbm %s926_s0, 256  ;;  %p563_p5 = scmp.lt.u32.totalorder %s776_s28, %s926_s0 }
  0x1a   : > { %p560_p4 = pnand %p559_p3, %p558_p2  ;;  %p564_p8 = scmp.lt.u32.totalorder %s562_s8, %s557_s5 }
  0x1b   : > { %p566_p9 = scmp.lt.u32.totalorder %s557_s5, %s776_s28 }
  0x1c   : > { %p561_p7 = pneg %p560_p4  ;;  %p565_p10 = por %p564_p8, %p563_p5 }
  0x1e   : > { %p567_p0 = por %p566_p9, %p565_p10 }
  0x20   : > { %p568_p1 = pnand %p567_p0, %p561_p7 }
  0x22   : > { %571 = shalt.err (!%p568_p1)
}
  0x23   : > { %s572_s17 = scalar_lea.vmem %s786_s30, 128  ;;  %s689_s19 = smov [#allocation2]  }
  0x24   : > { %p573_p2 = scmp.ne.s32.totalorder %s786_s30, %s572_s17  ;;  %s577_s26 = sshll.u32 %s689_s19, 4  ;;  %s578_s26 = int_to_ptr.vmem [resolvable:$false] %s577_s26 }
  0x25   : > { %s579_s27 = scalar_lea.vmem %s578_s26, 256  ;;  %p580_p11 = scmp.lt.s32.totalorder %s786_s30, %s578_s26 }
  0x26   : > { %p575_p4 = pnand %p573_p2, %p559_p3  ;;  %p581_p5 = scmp.lt.s32.totalorder %s579_s27, %s572_s17 }
  0x28   : > { %p576_p12 = pneg %p575_p4  ;;  %p582_p8 = por %p581_p5, %p580_p11 }
  0x2a   : > { %p583_p9 = pnand %p582_p8, %p576_p12 }
  0x2c   : > { %586 = shalt.err (!%p583_p9)
}
  0x2d   : > { %506 = dma.hbm_to_vmem [thread:$0]  (!%p782_p13), %s776_s28, 128, %s786_s30, %s118_s4  }
  0x2e   : > { %p936_p0 = scmp.lt.s32.totalorder %s687_s12, 3  ;;  %p937_p1 = scmp.ge.s32.totalorder %s687_s12, 1 }
  0x2f   : > { %s829_s7 = scalar_lea.hbm %s927_s1, %s495_s24  ;;  %s140_s8 = scalar_lea.vmem [#allocation5], %s481_s25 }
  0x30   : > { %p820_p7 = pnand %p937_p1, %p936_p0  ;;  %s148_s14 = sshll.u32 %s140_s8, 4  ;;  %s149_s14 = int_to_ptr.vmem [resolvable:$true] %s148_s14 }
  0x31   : > { %s137_s28 = scalar_lea.sflag [#allocation6], %s767_s23  ;;  %s587_s30 = scalar_lea.hbm %s829_s7, 128 }
  0x32   : > { %s938_s29 = scalar_select %p820_p7, 1, 0 }
  0x33   : > { %p588_p11 = scmp.ne.s32.totalorder %s829_s7, %s587_s30  ;;  %s592_s24 = scalar_lea.hbm %s927_s1, 256 }
  0x34   : > { %p593_p2 = scmp.lt.u32.totalorder %s829_s7, %s927_s1  ;;  %p594_p4 = scmp.lt.u32.totalorder %s592_s24, %s587_s30 }
  0x35   : > { %p590_p12 = pnand %p588_p11, %p559_p3  ;;  %p596_p8 = scmp.lt.u32.totalorder %s587_s30, %s829_s7 }
  0x36   : > { %p595_p5 = por %p594_p4, %p593_p2 }
  0x37   : > { %p591_p10 = pneg %p590_p12 }
  0x38   : > { %p597_p9 = por %p596_p8, %p595_p5 }
  0x3a   : > { %p598_p0 = pnand %p597_p9, %p591_p10 }
  0x3c   : > { %601 = shalt.err (!%p598_p0)
}
  0x3d   : > { %s602_s23 = scalar_lea.vmem %s149_s14, 128  ;;  %s690_s25 = smov [#allocation5]  }
  0x3e   : > { %p603_p1 = scmp.ne.s32.totalorder %s149_s14, %s602_s23  ;;  %s607_s26 = sshll.u32 %s690_s25, 4  ;;  %s608_s26 = int_to_ptr.vmem [resolvable:$false] %s607_s26 }
  0x3f   : > { %s609_s27 = scalar_lea.vmem %s608_s26, 256  ;;  %p610_p6 = scmp.lt.s32.totalorder %s149_s14, %s608_s26 }
  0x40   : > { %p605_p11 = pnand %p603_p1, %p559_p3  ;;  %p611_p7 = scmp.lt.s32.totalorder %s609_s27, %s602_s23 }
  0x42   : > { %p606_p12 = pneg %p605_p11  ;;  %p612_p2 = por %p611_p7, %p610_p6 }
  0x44   : > { %p613_p4 = pnand %p612_p2, %p606_p12 }
  0x46   : > { %616 = shalt.err (!%p613_p4)
}
  0x47   : > { %509 = dma.hbm_to_vmem [thread:$0]  (!%p782_p13), %s829_s7, 128, %s149_s14, %s137_s28  }
  0x48   : > { %p939_p10 = scmp.ne.s32.totalorder %s938_s29, 0 }
  0x49   : > { %s856_s5 = sand.u32 (!%p939_p10), 1, %s679_s10   ;;  %p940_p3 = scmp.ne.s32.totalorder (!%p939_p10), %s932_s20, 0 }
  0x4a   : > { %157 = sbr.rel (%p939_p10) target bundleno = 517 (0x205), region = 28  ;;  %s488_s6 = sshll.u32 (!%p939_p10), %s856_s5, 3 }
  0x4b   : > { %s160_s8 = scalar_lea.sflag (!%p939_p10), [#allocation3], %s856_s5  ;;  %s163_s30 = scalar_lea.vmem (!%p939_p10), [#allocation2], %s488_s6 }
  0x51   : > { %662 = dma.done.wait (%p940_p3), %s160_s8, 128  }
  0x52   : > { %664 = vsyncadd (%p940_p3), %s160_s8, 4294967168  ;;  %s169_s3 = scalar_lea.sflag [#allocation6], %s856_s5  ;;  %s172_s7 = scalar_lea.vmem [#allocation5], %s488_s6 }
  0x53   : > { %666 = dma.done.wait (%p940_p3), %s169_s3, 128  }
  0x54   : > { %668 = vsyncadd (%p940_p3), %s169_s3, 4294967168  ;;  %vm203_vm0 = vcmask 1042432   ;;  %v199_v0 = vld [vmem:[%s172_s7] sm:$0x77]  ;;  %v198_v1 = vld [vmem:[%s163_s30] sm:$0x77]  ;;  %v215_v10 = vlaneseq }
  0x55   : > { %v222_v2 = vcombine.high %v199_v0, %v199_v0  ;;  %v224_v3 = vsel %vm203_vm0, %v199_v0, 0.0  ;;  %v201_v4 = vcombine.high %v198_v1, %v198_v1  ;;  %v204_v6 = vsel %vm203_vm0, %v198_v1, 0.0  ;;  %s490_s20 = sshll.u32 %s856_s5, 2  ;;  %s492_s29 = sshll.u32 %s729_s13, 6 }
  0x56   : > { %v216_v11 = vshrl.u32 %v215_v10, 7  ;;  %v337_v12 = vand.u32 127, %v215_v10  ;;  %v691_v14 = vmov 839922192   ;;  %s197_s14 = scalar_lea.vmem [#allocation7], %s490_s20  ;;  %vm369_vm1 = vcmask 18432   ;;  %s882_s24 = scalar_lea.hbm %s928_s2, %s492_s29 }
  0x57   : > { %v225_v5 = vsel %vm203_vm0, %v222_v2, 0.0  ;;  %v205_v7 = vsel %vm203_vm0, %v201_v4, 0.0  ;;  %v213_v15 = vunpack.c.l.s4 %v691_v14  ;;  %s385_s28 = sshll.u32 %s197_s14, 4  ;;  %s372_s17 = scalar_lea.sflag [#allocation4], %s856_s5  ;;  %s884_s28 = int_to_ptr.vmem [resolvable:$true] %s385_s28 }
  0x58   : > { %v226_v8 = vadd.f32 %v225_v5, %v224_v3  ;;  %v206_v9 = vadd.f32 %v205_v7, %v204_v6  ;;  %v340_v13 = vsub.s32 %v337_v12, %v216_v11  ;;  %s617_s19 = scalar_lea.vmem %s884_s28, 64  ;;  %p941_p13 = scmp.ne.s32.totalorder %s933_s21, 0 }
  0x59   : > { %v214_v16 = vunpack.c.0.s8 %v213_v15  ;;  %p618_p6 = scmp.ne.s32.totalorder %s884_s28, %s617_s19  ;;  %s692_s13 = smov [#allocation7]  }
  0x5a   : > { %227 = vadd.xlane.f32.xlu0 %v226_v8  ;;  %s621_s23 = sshll.u32 %s692_s13, 4  ;;  %s622_s23 = int_to_ptr.vmem [resolvable:$false] %s621_s23 }
  0x5b   : > { %v217_v17 = vsub.s32 %v214_v16, %v216_v11  ;;  %p619_p7 = pnand %p618_p6, %p941_p13  ;;  %s623_s25 = scalar_lea.vmem %s622_s23, 128 }
  0x5c   : > { %p624_p8 = scmp.lt.s32.totalorder %s884_s28, %s622_s23  ;;  %p625_p9 = scmp.lt.s32.totalorder %s623_s25, %s617_s19 }
  0x5d   : > { %p620_p5 = pneg %p619_p7 }
  0x5e   : > { %207 = vadd.xlane.f32.xlu0 %v206_v9  ;;  %p626_p0 = por %p625_p9, %p624_p8 }
  0x60   : > { %p627_p1 = pnand %p626_p0, %p620_p5 }
  0xe7   : > { %v228_v18 = vpop.xlane.xlu0 %227 }
  0xe8   : > { %v229_v19 = vmul.f32 0.00390625, %v228_v18 }
  0xea   : > { %v237_v20 = vrot.slane %v229_v19, %v217_v17 }
  0xeb   : > { %v208_v21 = vpop.xlane.xlu0 %207 }
  0xec   : > { %v210_v22 = vmul.f32 0.00390625, %v208_v21  ;;  %v239_v23 = vsub.f32 %v199_v0, %v237_v20 }
  0xee   : > { %v218_v24 = vrot.slane %v210_v22, %v217_v17  ;;  %v244_v25 = vcombine.high %v239_v23, %v239_v23  ;;  %v316_v26 = vmul.f32 %v239_v23, %v239_v23 }
  0xf0   : > { %v220_v27 = vsub.f32 %v198_v1, %v218_v24  ;;  %246 = vmatprep.subr.mxu0 %v244_v25  ;;  %v318_v28 = vcombine.high %v316_v26, %v316_v26  ;;  %v320_v30 = vsel %vm203_vm0, %v316_v26, 0.0 }
  0xf1   : > { %247 = vmatpush1.xpose.msra.mxu0 %v239_v23 }
  0xf2   : > { %v241_v29 = vcombine.high %v220_v27, %v220_v27  ;;  %v321_v31 = vsel %vm203_vm0, %v318_v28, 0.0  ;;  %v325_v32 = vmul.f32 %v220_v27, %v220_v27 }
  0xf3   : > { %v322_v33 = vadd.f32 %v321_v31, %v320_v30 }
  0xf4   : > { %310 = vmatprep.mubr.f32.mxu0 %v241_v29  ;;  %v327_v34 = vcombine.high %v325_v32, %v325_v32  ;;  %v329_v35 = vsel %vm203_vm0, %v325_v32, 0.0 }
  0xf5   : > { %323 = vadd.xlane.f32.xlu1 %v322_v33  ;;  %311 = vmatmul.mubr.f32.vlgmr.msra.gmra.mrb[0].mxu0 %v220_v27 }
  0xf6   : > { %v330_v36 = vsel %vm203_vm0, %v327_v34, 0.0 }
  0xf7   : > { %v331_v37 = vadd.f32 %v330_v36, %v329_v35 }
  0xf9   : > { %332 = vadd.xlane.f32.xlu1 %v331_v37 }
 0x182   : > { %v324_v38 = vpop.xlane.xlu1 %323 }
 0x183   : > { %v334_v39 = vadd.f32 1e-08, %v324_v38  ;;  %v352_v45 = vrot.slane %v324_v38, %v340_v13 }
 0x185   : > { %v341_v40 = vrot.slane %v334_v39, %v340_v13 }
 0x186   : > { %v333_v50 = vpop.xlane.xlu1 %332 }
 0x187   : > { %551 = vrcp.f32 %v341_v40 }
 0x191   : > { %v552_v41 = vpop.eup %551 }
 0x1c8   : > { %v312_v42 = vpop.f32.mrb[0].mxu0 }
 0x1c9   : > { %v346_v43 = vmul.f32 %v552_v41, %v312_v42  ;;  %v314_v44 = vpop.f32.mrb[1].mxu0 }
 0x1cb   : > { %v347_v46 = vmul.f32 %v346_v43, %v346_v43  ;;  %v356_v47 = vmul.f32 2.0, %v346_v43 }
 0x1cd   : > { %v355_v48 = vmul.f32 %v352_v45, %v347_v46  ;;  %v357_v49 = vmul.f32 %v356_v47, %v312_v42 }
 0x1cf   : > { %v358_v51 = vsub.f32 %v333_v50, %v357_v49 }
 0x1d1   : > { %v359_v52 = vadd.f32 %v358_v51, %v355_v48 }
 0x1d3   : > { %v360_v53 = vmax.f32 %v359_v52, 0.0 }
 0x1d5   : > { %v361_v54 = vadd.f32 1e-08, %v360_v53 }
 0x1d7   : > { %553 = vrcp.f32 %v361_v54 }
 0x1e1   : > { %v554_v55 = vpop.eup %553 }
 0x1e2   : > { %v363_v56 = vmul.f32 %v554_v55, %v355_v48 }
 0x1e4   : > { %v364_v57 = vadd.f32 1e-08, %v363_v56 }
 0x1e6   : > { %555 = vlog2.f32 %v364_v57 }
 0x1f0   : > { %v556_v58 = vpop.eup %555 }
 0x1f1   : > { %v366_v59 = vmul.f32 0.6931472, %v556_v58 }
 0x1f3   : > { %v367_v60 = vmul.f32 0.4342945, %v366_v59 }
 0x1f5   : > { %v368_v61 = vmul.f32 10.0, %v367_v60 }
 0x1f7   : > { %370 = vst.msk [vmem:[%s197_s14] sm:$0x7] %vm369_vm1, %v368_v61 }
 0x1f8   : > { %630 = shalt.err (!%p627_p1)
}
 0x1f9   : > { %s631_s26 = scalar_lea.hbm %s882_s24, 64  ;;  %s635_s6 = scalar_lea.hbm %s928_s2, 128 }
 0x1fa   : > { %p632_p11 = scmp.ne.s32.totalorder %s882_s24, %s631_s26  ;;  %p636_p4 = scmp.lt.u32.totalorder %s882_s24, %s928_s2 }
 0x1fb   : > { %p637_p10 = scmp.lt.u32.totalorder %s635_s6, %s631_s26  ;;  %p639_p6 = scmp.lt.u32.totalorder %s631_s26, %s882_s24 }
 0x1fc   : > { %p633_p12 = pnand %p632_p11, %p941_p13 }
 0x1fd   : > { %p638_p3 = por %p637_p10, %p636_p4 }
 0x1fe   : > { %p634_p2 = pneg %p633_p12 }
 0x1ff   : > { %p640_p7 = por %p639_p6, %p638_p3 }
 0x201   : > { %p641_p5 = pnand %p640_p7, %p634_p2 }
 0x203   : > { %644 = shalt.err (!%p641_p5)
}
 0x204   : > { %501 = dma.vmem_to_hbm [thread:$0]  (%p941_p13), %s884_s28, 64, %s882_s24, %s372_s17  }
 0x205 PF: > { %s397_s3 = sand.u32 1, %s675_s9   ;;  %p942_p8 = scmp.ne.s32.totalorder %s934_s22, 0 }
 0x206   : > { %p943_p9 = scmp.ge.s32.totalorder %s687_s12, 2  ;;  %s398_s7 = scalar_lea.sflag [#allocation4], %s397_s3 }
 0x208   : > { %p511_p0 = pnand %p943_p9, %p942_p8 }
 0x20a   : > { %670 = dma.done.wait (!%p511_p0), %s398_s7, 64  }
 0x20b   : > { %672 = vsyncadd (!%p511_p0), %s398_s7, 4294967232  ;;  %p18_p1 = scmp.ge.s32.totalorder %s733_s15, 4   ;;  %s944_s9 = smov %s679_s10 }
 0x20c   : > { %s945_s10 = smov %s683_s11  ;;  %s946_s11 = smov %s745_s18 }
 0x20d   : > { %s947_s12 = smov %s733_s15  ;;  %20 = sbr.rel (!%p18_p1) target bundleno = 7 (0x7), region = 86 }
 0x214   :  { %403 = vsyncpa [#allocation3], 1 }
 0x215   :  { %405 = vsyncpa [#allocation3 + $0x1], 1 }
 0x216   :  { %406 = vsyncpa [#allocation6], 1 }
 0x217   :  { %408 = vsyncpa [#allocation6 + $0x1], 1 }
 0x218   :  { %409 = vsyncpa [#allocation4], 1 }
 0x219   :  { %411 = vsyncpa [#allocation4 + $0x1], 1 }

</bundles_post_ra>
